<compile_context>
chip_gen: v6e
topology: v6e:2x2x1
jax: 0.10.0
libtpu: 0.0.40
codegen_flags: <defaults>
</compile_context>

<pallas_src>
import math

import jax
import jax.numpy as jnp
from jax.experimental import pallas as pl
from jax.experimental.pallas import tpu as pltpu


def _gelu_tanh(x):
    # GELU with tanh approximation (matches nn.GELU(approximate='tanh')).
    c = math.sqrt(2.0 / math.pi)
    return 0.5 * x * (1.0 + jnp.tanh(c * (x + 0.044715 * x * x * x)))


def _round_up(x, m):
    return (x + m - 1) // m * m


def _make_kernel(samples_per_tile):
    """Kernel over one row-tile of `samples_per_tile` whole samples."""

    def kernel(d_ref, x_ref, yemb_ref, w1_ref, b1_ref, w2_ref, b2_ref, o_ref):
        # d_ref:    (TILE_ROWS, 1)      f32   per-row drop flag (0/1)
        # x_ref:    (TILE_ROWS, C_in)   bf16  flattened (sample, token) rows
        # yemb_ref: (T_pad, C_in)       bf16  unconditional embedding (resident)
        # w1_ref:   (C_in, H_pad) bf16, b1_ref: (1, H_pad) f32
        # w2_ref:   (H_pad, H_pad) bf16, b2_ref: (1, H_pad) f32
        # o_ref:    (TILE_ROWS, H_pad)  f32
        x = x_ref[...]
        yemb_t = jnp.tile(yemb_ref[...], (samples_per_tile, 1))  # (TILE_ROWS, C_in)

        # token_drop: exact per-row select (VPU), hidden under the MXU.
        drop = jnp.broadcast_to(d_ref[...] > 0.5, x.shape)
        x_sel = jnp.where(drop, yemb_t, x)

        # fc1 (bf16 MXU, f32 accumulate) + bias + GELU(tanh) in f32.
        h = jnp.dot(x_sel, w1_ref[...], preferred_element_type=jnp.float32)
        h = _gelu_tanh(h + b1_ref[...])

        # fc2 (bf16 MXU, f32 accumulate) + bias.
        out = jnp.dot(h.astype(w2_ref.dtype), w2_ref[...],
                      preferred_element_type=jnp.float32)
        o_ref[...] = (out + b2_ref[...]).astype(o_ref.dtype)

    return kernel


def text_embedder_forward(text, y_embedding, params, *, train,
                          uncond_prob=0.1, force_drop_ids=None, rng=None):
    """JAX/Pallas equivalent of TextEmbedder.forward.

    text:         (B, T, C_in) float32
    y_embedding:  (T, C_in)    float32
    params:       dict with w1 (C_in,H), b1 (H,), w2 (H,H), b2 (H,)
    force_drop_ids: optional (B,) int array; drop where == 1
    """
    B, T, C_in = text.shape
    H = params["w1"].shape[1]

    if train:
        assert text.shape[-2:] == y_embedding.shape

    use_dropout = uncond_prob > 0
    if (train and use_dropout) or (force_drop_ids is not None):
        # Blending will happen -> shapes must match even in eval mode.
        assert y_embedding.shape == (T, C_in)
        if force_drop_ids is None:
            assert rng is not None
            drop_ids = jax.random.uniform(rng, (B,)) < uncond_prob
        else:
            drop_ids = (force_drop_ids == 1)
        drop_f = drop_ids.astype(jnp.float32)
    else:
        drop_f = jnp.zeros((B,), dtype=jnp.float32)

    # --- Alignment ---------------------------------------------------------
    # H -> lane-dense multiple of 128 (256 if H > 128, to fill the 2x256 MXU
    # width on v6e/v7x).  T -> multiple of 16 (bf16 sublane packing).
    # C_in is left UNPADDED: blocks whose last dim equals the full array dim
    # are exempt from the (8,128) rule, and Mosaic handles K = C_in < 128.
    H_pad = _round_up(H, 256) if H > 128 else _round_up(H, 128)
    T_pad = _round_up(T, 16)

    # --- Row tiling --------------------------------------------------------
    # Flatten (B, T_pad) -> rows.  ~512 rows per tile, a whole number of
    # samples per tile (so y_embedding broadcasts cleanly in-kernel); keep
    # >= 2 tiles when B >= 2 so both v7x TensorCores get work.
    spt = max(1, min(B, max(1, 512 // T_pad)))          # samples per tile
    if B >= 2 and (_round_up(B, spt) // spt) < 2:
        spt = (B + 1) // 2
    B_pad = _round_up(B, spt)
    tile_rows = spt * T_pad                              # multiple of 16
    rows = B_pad * T_pad
    n_tiles = rows // tile_rows

    f32, bf16 = jnp.float32, jnp.bfloat16

    # Activations / weights in bf16 for the MXU; biases stay f32.
    x = text.astype(bf16)
    if (T_pad != T) or (B_pad != B):
        x = jnp.pad(x, ((0, B_pad - B), (0, T_pad - T), (0, 0)))
    x_rows = x.reshape(rows, C_in)

    yemb = y_embedding.astype(bf16)
    if T_pad != T:
        yemb = jnp.pad(yemb, ((0, T_pad - T), (0, 0)))

    if B_pad != B:
        drop_f = jnp.pad(drop_f, ((0, B_pad - B),))
    d_rows = jnp.repeat(drop_f, T_pad).reshape(rows, 1)

    w1 = jnp.pad(params["w1"].astype(bf16), ((0, 0), (0, H_pad - H)))
    b1 = jnp.pad(params["b1"].astype(f32), ((0, H_pad - H),)).reshape(1, H_pad)
    w2 = jnp.pad(params["w2"].astype(bf16), ((0, H_pad - H), (0, H_pad - H)))
    b2 = jnp.pad(params["b2"].astype(f32), ((0, H_pad - H),)).reshape(1, H_pad)

    flops = 2 * rows * C_in * H_pad + 2 * rows * H_pad * H_pad
    bytes_accessed = (2 * rows * C_in                 # text (bf16)
                      + 2 * T_pad * C_in              # y_embedding (bf16)
                      + 2 * (C_in * H_pad + H_pad * H_pad)  # weights (bf16)
                      + 4 * 2 * H_pad                 # biases (f32)
                      + 4 * rows                      # drop rows (f32)
                      + 4 * rows * H_pad)             # output (f32)

    kernel = _make_kernel(spt)
    row_map = lambda i: (i, 0)
    const_map = lambda i: (0, 0)

    out_p = pl.pallas_call(
        kernel,
        out_shape=jax.ShapeDtypeStruct((rows, H_pad), f32),
        grid=(n_tiles,),
        in_specs=[
            pl.BlockSpec((tile_rows, 1), row_map),        # per-row drop flags
            pl.BlockSpec((tile_rows, C_in), row_map),     # text rows
            pl.BlockSpec((T_pad, C_in), const_map),       # y_embedding (resident)
            pl.BlockSpec((C_in, H_pad), const_map),       # w1
            pl.BlockSpec((1, H_pad), const_map),          # b1
            pl.BlockSpec((H_pad, H_pad), const_map),      # w2
            pl.BlockSpec((1, H_pad), const_map),          # b2
        ],
        out_specs=pl.BlockSpec((tile_rows, H_pad), row_map),
        compiler_params=pltpu.CompilerParams(
            dimension_semantics=("parallel",)),
        cost_estimate=pl.CostEstimate(
            flops=flops,
            transcendentals=rows * H_pad,
            bytes_accessed=bytes_accessed),
    )(d_rows, x_rows, yemb, w1, b1, w2, b2)

    # TODO(synk): a consumer that can read the padded (rows, H_pad) slab
    # directly (columns >= H are zero, padded rows are garbage) would avoid
    # this extra HBM slice pass.
    return out_p.reshape(B_pad, T_pad, H_pad)[:B, :T, :H]


def _reference_forward(text, y_embedding, params, drop_mask):
    # Pure-JAX reference mirroring the kernel's bf16 rounding (f32 accumulate).
    bf16, f32 = jnp.bfloat16, jnp.float32
    x = jnp.where(drop_mask[:, None, None],
                  y_embedding.astype(bf16)[None],
                  text.astype(bf16)).astype(f32)
    w1 = params["w1"].astype(bf16).astype(f32)
    w2 = params["w2"].astype(bf16).astype(f32)
    h = _gelu_tanh(x @ w1 + params["b1"])
    h = h.astype(bf16).astype(f32)
    return h @ w2 + params["b2"]


if __name__ == "__main__":
    key = jax.random.PRNGKey(0)
    k_text, k_yemb, k_w1, k_b1, k_w2, k_b2 = jax.random.split(key, 6)

    # Small shapes consistent with the module's forward.
    B, T, C_in, H = 2, 8, 16, 32

    text = jax.random.normal(k_text, (B, T, C_in), dtype=jnp.float32)
    # y_embedding ~ randn(token_num, in_channels) / sqrt(in_channels)
    y_embedding = (jax.random.normal(k_yemb, (T, C_in), dtype=jnp.float32)
                   / math.sqrt(C_in))

    params = {
        "w1": jax.random.normal(k_w1, (C_in, H), dtype=jnp.float32) * 0.2,
        "b1": jax.random.normal(k_b1, (H,), dtype=jnp.float32) * 0.1,
        "w2": jax.random.normal(k_w2, (H, H), dtype=jnp.float32) * 0.2,
        "b2": jax.random.normal(k_b2, (H,), dtype=jnp.float32) * 0.1,
    }

    # Deterministic drop pattern via force_drop_ids.
    # TODO(synk): torch.rand(...).cuda() RNG stream has no bit-exact JAX
    # equivalent; random dropping uses jax.random via `rng=` instead.
    force_drop_ids = jnp.array([1, 0], dtype=jnp.int32)

    out = text_embedder_forward(text, y_embedding, params, train=True,
                                uncond_prob=0.1,
                                force_drop_ids=force_drop_ids)
    out = jax.block_until_ready(out)

    ref = _reference_forward(text, y_embedding, params, force_drop_ids == 1)
    assert out.shape == (B, T, H)
    # bf16 MXU inputs -> looser tolerance than the pure-f32 check.
    assert jnp.allclose(out, ref, atol=1e-2, rtol=1e-2), \
        float(jnp.max(jnp.abs(out - ref)))

    print("KERNEL_OK")
</pallas_src>

<mosaic_0001>
module attributes {stable_mosaic.version = 11 : i64} {
  func.func @kernel(%arg0: i32, %arg1: memref<16x1xf32, #tpu.memory_space<vmem>>, %arg2: memref<16x16xbf16, #tpu.memory_space<vmem>>, %arg3: memref<16x16xbf16, #tpu.memory_space<vmem>>, %arg4: memref<16x128xbf16, #tpu.memory_space<vmem>>, %arg5: memref<1x128xf32, #tpu.memory_space<vmem>>, %arg6: memref<128x128xbf16, #tpu.memory_space<vmem>>, %arg7: memref<1x128xf32, #tpu.memory_space<vmem>>, %arg8: memref<16x128xf32, #tpu.memory_space<vmem>>) attributes {dimension_semantics = [#tpu.dimension_semantics<parallel>], iteration_bounds = array<i64: 2>, scalar_prefetch = 0 : i64, scratch_operands = 0 : i64, tpu.core_type = #tpu.core_type<tc>, window_params = [{transform_indices = @transform_0, window_bounds = array<i64: 16, 1>}, {transform_indices = @transform_1, window_bounds = array<i64: 16, 16>}, {pipeline_mode = #tpu.pipeline_mode<synchronous>, transform_indices = @transform_2, window_bounds = array<i64: 16, 16>}, {pipeline_mode = #tpu.pipeline_mode<synchronous>, transform_indices = @transform_3, window_bounds = array<i64: 16, 128>}, {pipeline_mode = #tpu.pipeline_mode<synchronous>, transform_indices = @transform_4, window_bounds = array<i64: 1, 128>}, {pipeline_mode = #tpu.pipeline_mode<synchronous>, transform_indices = @transform_5, window_bounds = array<i64: 128, 128>}, {pipeline_mode = #tpu.pipeline_mode<synchronous>, transform_indices = @transform_6, window_bounds = array<i64: 1, 128>}, {transform_indices = @transform_7, window_bounds = array<i64: 16, 128>}]} {
    %c0 = arith.constant 0 : index
    %c0_0 = arith.constant 0 : index
    %0 = vector.load %arg2[%c0, %c0_0] : memref<16x16xbf16, #tpu.memory_space<vmem>>, vector<16x16xbf16>
    %c0_1 = arith.constant 0 : index
    %c0_2 = arith.constant 0 : index
    %1 = vector.load %arg3[%c0_1, %c0_2] : memref<16x16xbf16, #tpu.memory_space<vmem>>, vector<16x16xbf16>
    %c0_3 = arith.constant 0 : index
    %c0_4 = arith.constant 0 : index
    %2 = vector.load %arg1[%c0_3, %c0_4] : memref<16x1xf32, #tpu.memory_space<vmem>>, vector<16x1xf32>
    %cst = arith.constant 5.000000e-01 : f32
    %3 = vector.broadcast %cst : f32 to vector<16x1xf32>
    %4 = arith.cmpf ogt, %2, %3 : vector<16x1xf32>
    %5 = vector.shape_cast %4 : vector<16x1xi1> to vector<16x1xi1>
    %6 = vector.broadcast %5 : vector<16x1xi1> to vector<16x16xi1>
    %7 = arith.select %6, %1, %0 : vector<16x16xi1>, vector<16x16xbf16>
    %c0_5 = arith.constant 0 : index
    %c0_6 = arith.constant 0 : index
    %8 = vector.load %arg4[%c0_5, %c0_6] : memref<16x128xbf16, #tpu.memory_space<vmem>>, vector<16x128xbf16>
    %cst_7 = arith.constant dense<0.000000e+00> : vector<16x128xf32>
    %9 = tpu.matmul %7, %8, %cst_7 {dimension_numbers = #tpu.dot_dimension_numbers<[1], [0], [0], [1], [0, 0, 1, 1], [], []>} : vector<16x16xbf16>, vector<16x128xbf16>, vector<16x128xf32> -> vector<16x128xf32>
    %c0_8 = arith.constant 0 : index
    %c0_9 = arith.constant 0 : index
    %10 = vector.load %arg5[%c0_8, %c0_9] : memref<1x128xf32, #tpu.memory_space<vmem>>, vector<1x128xf32>
    %11 = vector.broadcast %10 : vector<1x128xf32> to vector<16x128xf32>
    %12 = arith.addf %9, %11 : vector<16x128xf32>
    %cst_10 = arith.constant 5.000000e-01 : f32
    %13 = vector.broadcast %cst_10 : f32 to vector<16x128xf32>
    %14 = arith.mulf %13, %12 : vector<16x128xf32>
    %cst_11 = arith.constant 4.471500e-02 : f32
    %15 = vector.broadcast %cst_11 : f32 to vector<16x128xf32>
    %16 = arith.mulf %15, %12 : vector<16x128xf32>
    %17 = arith.mulf %16, %12 : vector<16x128xf32>
    %18 = arith.mulf %17, %12 : vector<16x128xf32>
    %19 = arith.addf %12, %18 : vector<16x128xf32>
    %cst_12 = arith.constant 0.797884583 : f32
    %20 = vector.broadcast %cst_12 : f32 to vector<16x128xf32>
    %21 = arith.mulf %20, %19 : vector<16x128xf32>
    %22 = math.tanh %21 : vector<16x128xf32>
    %cst_13 = arith.constant 1.000000e+00 : f32
    %23 = vector.broadcast %cst_13 : f32 to vector<16x128xf32>
    %24 = arith.addf %23, %22 : vector<16x128xf32>
    %25 = arith.mulf %14, %24 : vector<16x128xf32>
    %26 = arith.truncf %25 : vector<16x128xf32> to vector<16x128xbf16>
    %c0_14 = arith.constant 0 : index
    %c0_15 = arith.constant 0 : index
    %27 = vector.load %arg6[%c0_14, %c0_15] : memref<128x128xbf16, #tpu.memory_space<vmem>>, vector<128x128xbf16>
    %cst_16 = arith.constant dense<0.000000e+00> : vector<16x128xf32>
    %28 = tpu.matmul %26, %27, %cst_16 {dimension_numbers = #tpu.dot_dimension_numbers<[1], [0], [0], [1], [0, 0, 1, 1], [], []>} : vector<16x128xbf16>, vector<128x128xbf16>, vector<16x128xf32> -> vector<16x128xf32>
    %c0_17 = arith.constant 0 : index
    %c0_18 = arith.constant 0 : index
    %29 = vector.load %arg7[%c0_17, %c0_18] : memref<1x128xf32, #tpu.memory_space<vmem>>, vector<1x128xf32>
    %30 = vector.broadcast %29 : vector<1x128xf32> to vector<16x128xf32>
    %31 = arith.addf %28, %30 : vector<16x128xf32>
    %c0_19 = arith.constant 0 : index
    %c0_20 = arith.constant 0 : index
    %32 = vector.load %arg8[%c0_19, %c0_20] : memref<16x128xf32, #tpu.memory_space<vmem>>, vector<16x128xf32>
    tpu.vector_store %arg8[%c0_19, %c0_20], %31 {strides = array<i32>} : memref<16x128xf32, #tpu.memory_space<vmem>>, vector<16x128xf32>,
    return
  }
  func.func @transform_0(%arg0: i32) -> (i32, i32) {
    %c0_i32 = arith.constant 0 : i32
    %c0_i32_0 = arith.constant 0 : i32
    return %arg0, %c0_i32 : i32, i32
  }
  func.func @transform_1(%arg0: i32) -> (i32, i32) {
    %c0_i32 = arith.constant 0 : i32
    %c0_i32_0 = arith.constant 0 : i32
    return %arg0, %c0_i32 : i32, i32
  }
  func.func @transform_2(%arg0: i32) -> (i32, i32) {
    %c0_i32 = arith.constant 0 : i32
    %c0_i32_0 = arith.constant 0 : i32
    %c0_i32_1 = arith.constant 0 : i32
    return %c0_i32, %c0_i32_0 : i32, i32
  }
  func.func @transform_3(%arg0: i32) -> (i32, i32) {
    %c0_i32 = arith.constant 0 : i32
    %c0_i32_0 = arith.constant 0 : i32
    %c0_i32_1 = arith.constant 0 : i32
    return %c0_i32, %c0_i32_0 : i32, i32
  }
  func.func @transform_4(%arg0: i32) -> (i32, i32) {
    %c0_i32 = arith.constant 0 : i32
    %c0_i32_0 = arith.constant 0 : i32
    %c0_i32_1 = arith.constant 0 : i32
    return %c0_i32, %c0_i32_0 : i32, i32
  }
  func.func @transform_5(%arg0: i32) -> (i32, i32) {
    %c0_i32 = arith.constant 0 : i32
    %c0_i32_0 = arith.constant 0 : i32
    %c0_i32_1 = arith.constant 0 : i32
    return %c0_i32, %c0_i32_0 : i32, i32
  }
  func.func @transform_6(%arg0: i32) -> (i32, i32) {
    %c0_i32 = arith.constant 0 : i32
    %c0_i32_0 = arith.constant 0 : i32
    %c0_i32_1 = arith.constant 0 : i32
    return %c0_i32, %c0_i32_0 : i32, i32
  }
  func.func @transform_7(%arg0: i32) -> (i32, i32) {
    %c0_i32 = arith.constant 0 : i32
    %c0_i32_0 = arith.constant 0 : i32
    return %arg0, %c0_i32 : i32, i32
  }
}

</mosaic_0001>

<bundles_post_ra>
// kernel: tpu_custom_call.1
= control target key start
LH: loop header
LB: loop body
LE: loop exit
PB: predicated region body
PF: predicated region fallthrough
CT: control target
= control target key end

     0   :  { %12 = vsyncpa [#allocation3], 0  ;;  %s1160_s0 = inlined_call_operand.vmem [shape: f32[32,1], index: 0, kind: input, shape index: {}]   ;;  %s1161_s1 = inlined_call_operand.vmem [shape: bf16[32,16], index: 1, kind: input, shape index: {}]   ;;  %s1162_s2 = inlined_call_operand.hbm [shape: bf16[16,16], index: 2, kind: input, shape index: {}]   ;;  %s1163_s3 = inlined_call_operand.hbm [shape: bf16[16,128], index: 3, kind: input, shape index: {}]   ;;  %s1164_s4 = inlined_call_operand.vmem [shape: f32[1,128], index: 4, kind: input, shape index: {}]   ;;  %s1165_s5 = inlined_call_operand.vmem [shape: bf16[128,128], index: 5, kind: input, shape index: {}]   ;;  %s1166_s6 = inlined_call_operand.vmem [shape: f32[1,128], index: 6, kind: input, shape index: {}]   ;;  %s1167_s7 = inlined_call_operand.hbm [shape: f32[32,128], index: 7, kind: output, shape index: {}]  }
   0x1   :  { %13 = vsyncpa [#allocation6], 0 }
   0x2   :  { %14 = vsyncpa [#allocation4], 0 }
   0x3   :  { %16 = vsyncpa [#allocation4 + $0x1], 0  ;;  %s985_s24 = smov 0   ;;  %s987_s25 = smov 0  }
   0x4   :  { %s989_s26 = smov 0   ;;  %s991_s27 = smov 0  }
   0x5 LB: > { %s1006_s28 = sadd.s32 4294967295, %s933_s27   ;;  %s663_s29 = sadd.s32 4294967294, %s933_s27   ;;  %s933_s27 = sphi %s991_s27, %s1181_s27   ;;  %s929_s26 = sphi %s989_s26, %s1180_s26   ;;  %s925_s25 = sphi %s987_s25, %s1179_s25   ;;  %s921_s24 = sphi %s985_s24, %s1178_s24  }
   0x6   : > { %s1010_s30 = sadd.s32 1, %s933_s27   ;;  %s186_s8 = sadd.s32 1, %s929_s26 }
   0x7   : > { %s183_s9 = ssub.s32 %s933_s27, %s1010_s30  ;;  %p196_p0 = scmp.ne.s32.totalorder %s929_s26, %s925_s25 }
   0x8   : > { %p184_p1 = scmp.eq.s32.totalorder %s183_s9, 0  ;;  %p197_p2 = scmp.eq.s32.totalorder %s1006_s28, 1 }
   0x9   : > { %p202_p3 = scmp.ne.s32.totalorder %s925_s25, %s921_s24  ;;  %p203_p4 = scmp.eq.s32.totalorder %s663_s29, 1 }
   0xa   : > { %s1021_s10 = scalar_select %p184_p1, %s929_s26, %s186_s8  }
   0xb   : > { %p1023_p5 = por %p197_p2, %p196_p0  ;;  %p1027_p6 = por %p203_p4, %p202_p3 }
   0xc   : > { %p664_p7 = scmp.ge.s32.totalorder %s933_s27, 1  ;;  %p210_p8 = scmp.lt.s32.totalorder %s933_s27, 3 }
   0xd   : > { %s1170_s12 = scalar_select %p1027_p6, 1, 0 }
   0xe   : > { %p1168_p9 = scmp.eq.s32.totalorder %s1006_s28, 0  ;;  %p1034_p10 = pnand %p664_p7, %p210_p8 }
   0xf   : > { %s935_s14 = smov [#allocation2]   ;;  %s936_s17 = smov [#allocation5]  }
  0x10   : > { %s222_s15 = sshll.u32 %s935_s14, 4  ;;  %p742_p11 = pneg %p1034_p10  ;;  %s223_s15 = int_to_ptr.vmem [resolvable:$true] %s222_s15 }
  0x11   : > { %s235_s18 = sshll.u32 %s936_s17, 4  ;;  %s824_s19 = scalar_lea.vmem %s223_s15, 128  ;;  %s236_s18 = int_to_ptr.vmem [resolvable:$true] %s235_s18 }
  0x12   : > { %p1042_p12 = pnand %p1168_p9, %p742_p11  ;;  %p825_p0 = scmp.ne.s32.totalorder %s223_s15, %s824_s19 }
  0x13   : > { %p832_p3 = scmp.lt.s32.totalorder %s223_s15, %s223_s15  ;;  %p833_p4 = scmp.lt.s32.totalorder %s824_s19, %s824_s19 }
  0x14   : > { %p815_p13 = pneg %p1042_p12 }
  0x15   : > { %p834_p7 = por %p833_p4, %p832_p3 }
  0x16   : > { %p827_p1 = pnand %p825_p0, %p815_p13 }
  0x18   : > { %p828_p2 = pneg %p827_p1 }
  0x1a   : > { %p835_p8 = pnand %p834_p7, %p828_p2 }
  0x1c   : > { %838 = shalt.err (!%p835_p8)
}
  0x1d   : > { %s937_s20 = smov 64   ;;  %s938_s21 = smov 4  }
  0x1e   : > { %745 = dma.hbm_to_vmem [thread:$0]  (!%p1042_p12), %s1162_s2, 128, %s223_s15, [#allocation3], %s937_s20, %s937_s20, %s938_s21  }
  0x1f   : > { %s850_s29 = scalar_lea.vmem %s236_s18, 128  ;;  %p858_p9 = scmp.lt.s32.totalorder %s236_s18, %s236_s18 }
  0x20   : > { %p851_p11 = scmp.ne.s32.totalorder %s236_s18, %s850_s29  ;;  %p859_p6 = scmp.lt.s32.totalorder %s850_s29, %s850_s29 }
  0x22   : > { %p853_p0 = pnand %p851_p11, %p815_p13  ;;  %p860_p3 = por %p859_p6, %p858_p9 }
  0x24   : > { %p854_p1 = pneg %p853_p0 }
  0x26   : > { %p861_p2 = pnand %p860_p3, %p854_p1 }
  0x28   : > { %864 = shalt.err (!%p861_p2)
}
  0x29   : > { %748 = dma.hbm_to_vmem [thread:$0]  (!%p1042_p12), %s1163_s3, 128, %s236_s18, [#allocation6], %s937_s20, %s937_s20, %s938_s21  }
  0x2a   : > { %278 = sbr.rel (%p1034_p10) target bundleno = 635 (0x27b), region = 48  ;;  %p1173_p4 = scmp.eq.s32.totalorder (!%p1034_p10), %s1006_s28, 0 }
  0x2f   : > { %908 = dma.done.wait (%p1173_p4), [#allocation3], 128   ;;  %p1174_p13 = pmov %p1173_p4 }
  0x30   : > { %p1175_p7 = pmov %p1173_p4 }
  0x31   : > { %910 = vsyncadd (%p1174_p13), [#allocation3], 4294967168 }
  0x32   : > { %912 = dma.done.wait (%p1175_p7), [#allocation6], 128   ;;  %p1176_p6 = pmov %p1173_p4 }
  0x33   : > { %s672_s14 = sshll.u32 %s1006_s28, 1  ;;  %v939_v0 = vmov 0   ;;  %v800_v5 = vld [vmem:[#allocation5] sm:$0xff]   ;;  %v940_v6 = vmov 0.0   ;;  %vm941_vm2 = vmmov 0   ;;  %vm375_vm7 = vcmask 130048  }
  0x34   : > { %914 = vsyncadd (%p1176_p6), [#allocation6], 4294967168  ;;  %799 = vset.pattern.permute.xlu0 %v939_v0  ;;  %p320_p9 = scmp.lt.s32.totalorder %s672_s14, 3  ;;  %706 = vmatprep.subr.bf16.mxu0 %v940_v6  ;;  %v335_v9 = vld [vmem:[#allocation2] sm:$0xf]  ;;  %v801_v16 = vld [vmem:[%s1165_s5 + $0x38] sm:$0xff]  }
  0x35   : > { %712 = vmatprep.subr.bf16.mxu1 %v940_v6  ;;  %707 = vmatpush3.bf16.msra.mxu0 %v800_v5  ;;  %v336_v12 = vld [vmem:[#allocation2 + $0x4] sm:$0xf]  ;;  %v802_v17 = vld [vmem:[%s1165_s5 + $0x30] sm:$0xff]   ;;  %v803_v18 = vld [vmem:[%s1165_s5 + $0x28] sm:$0xff]   ;;  %s316_s9 = sand.u32 1, %s925_s25  }
  0x36   : > { %s1183_s14 = smov (!%p320_p9, %s672_s14), 3  ;;  %708 = vmatprep.mubr.msk.bf16.mxu0 %vm941_vm2, %v940_v6  ;;  %728 = vmatprep.mubr.msk.bf16.mxu1 %vm941_vm2, %v940_v6  ;;  %v804_v19 = vld [vmem:[%s1165_s5 + $0x20] sm:$0xff]   ;;  %v805_v20 = vld [vmem:[%s1165_s5 + $0x18] sm:$0xff]   ;;  %v806_v21 = vld [vmem:[%s1165_s5 + $0x10] sm:$0xff]   ;;  %s1120_s22 = scalar_lea.sflag [#allocation4], %s316_s9 }
  0x37   : > { %s673_s13 = sshll.u32 %s1183_s14, 3  ;;  %s675_s18 = sshll.u32 %s1183_s14, 2  ;;  %713 = vmatpush3.bf16.msra.mxu1 %v801_v16  ;;  %v807_v22 = vld [vmem:[%s1165_s5 + $0x8] sm:$0xff]   ;;  %v808_v23 = vld [vmem:[%s1165_s5] sm:$0xff]  }
  0x38   : > { %s323_s17 = scalar_lea.vmem %s1160_s0, %s673_s13  ;;  %s329_s21 = scalar_lea.vmem %s1161_s1, %s675_s18  ;;  %714 = vmatprep.subr.bf16.mxu1 %v940_v6  ;;  %v676_v24 = vld [vmem:[%s1164_s4] ss:$0 sm:$0xff] }
  0x39   : > { %v337_v1 = vld [vmem:[%s323_s17] sm:$0xff]  ;;  %v338_v2 = vld [vmem:[%s323_s17 + $0x8] sm:$0xff]  ;;  %s671_s14 = sshll.u32 %s316_s9, 4  ;;  %s694_s18 = sshll.u32 %s1006_s28, 8 }
  0x3a   : > { %vm339_vm0 = vcmp.gt.f32.partialorder %v337_v1, 0.5  ;;  %vm340_vm1 = vcmp.gt.f32.partialorder %v338_v2, 0.5  ;;  %v333_v8 = vld [vmem:[%s329_s21] sm:$0xf]  ;;  %v334_v11 = vld [vmem:[%s329_s21 + $0x4] sm:$0xf]  ;;  %s1118_s21 = scalar_lea.hbm %s1167_s7, %s694_s18 }
  0x3b   : > { %v341_v3 = vsel %vm339_vm0, 1, %v939_v0  ;;  %v342_v4 = vsel %vm340_vm1, 1, %v939_v0  ;;  %715 = vmatpush3.bf16.msra.mxu1 %v802_v17  ;;  %v680_v50 = vld [vmem:[%s1166_s6] ss:$0 sm:$0xff]  ;;  %s318_s16 = scalar_lea.vmem [#allocation7], %s671_s14  ;;  %s942_s28 = smov [#allocation7]  }
  0x3c   : > { %344 = vperm.xlu0 %799, %v341_v3   ;;  %716 = vmatprep.subr.bf16.mxu1 %v940_v6  ;;  %s567_s17 = sshll.u32 %s318_s16, 4  ;;  %s869_s29 = sshll.u32 %s942_s28, 4  ;;  %s1113_s17 = int_to_ptr.vmem [resolvable:$true] %s567_s17  ;;  %s870_s29 = int_to_ptr.vmem [resolvable:$false] %s869_s29 }
  0x3d   : > { %s865_s23 = scalar_lea.vmem %s1113_s17, 256  ;;  %s871_s8 = scalar_lea.vmem %s870_s29, 512 }
  0x3e   : > { %p866_p10 = scmp.ne.s32.totalorder %s1113_s17, %s865_s23  ;;  %p872_p11 = scmp.lt.s32.totalorder %s1113_s17, %s870_s29 }
  0x3f   : > { %717 = vmatpush3.bf16.msra.mxu1 %v803_v18  ;;  %p873_p0 = scmp.lt.s32.totalorder %s871_s8, %s865_s23 }
  0x40   : > { %347 = vperm.xlu0 %799, %v342_v4   ;;  %718 = vmatprep.subr.bf16.mxu1 %v940_v6  ;;  %p867_p12 = pnand %p866_p10, %p1023_p5 }
  0x41   : > { %p874_p1 = por %p873_p0, %p872_p11 }
  0x42   : > { %p868_p8 = pneg %p867_p12 }
  0x43   : > { %719 = vmatpush3.bf16.msra.mxu1 %v804_v19 }
  0x44   : > { %720 = vmatprep.subr.bf16.mxu1 %v940_v6  ;;  %p875_p3 = pnand %p874_p1, %p868_p8 }
  0x47   : > { %721 = vmatpush3.bf16.msra.mxu1 %v805_v20 }
  0x48   : > { %722 = vmatprep.subr.bf16.mxu1 %v940_v6 }
  0x4b   : > { %723 = vmatpush3.bf16.msra.mxu1 %v806_v21 }
  0x4c   : > { %724 = vmatprep.subr.bf16.mxu1 %v940_v6 }
  0x4f   : > { %725 = vmatpush3.bf16.msra.mxu1 %v807_v22 }
  0x50   : > { %726 = vmatprep.subr.bf16.mxu1 %v940_v6 }
  0x53   : > { %727 = vmatpush3.bf16.msra.mxu1 %v808_v23 }
  0xb7   : > { %v345_v7 = vpop.permute.xlu0 %344 }
  0xb8   : > { %vm349_vm3 = vcmp.eq.s32.totalorder %v345_v7, 1 }
  0xb9   : > { %vm351_vm4 = vmpackc.low %vm349_vm3, %vm349_vm3 }
  0xba   : > { %v353_v13 = vsel %vm351_vm4, %v335_v9, %v333_v8 }
  0xbb   : > { %v348_v10 = vpop.permute.xlu0 %347 }
  0xbc   : > { %vm350_vm5 = vcmp.eq.s32.totalorder %v348_v10, 1 }
  0xbd   : > { %vm352_vm6 = vmpackc.low %vm350_vm5, %vm350_vm5 }
  0xbe   : > { %v354_v14 = vsel %vm352_vm6, %v336_v12, %v334_v11 }
  0xbf   : > { %v677_v15 = vcombine.low %v353_v13, %v354_v14 }
  0xc1   : > { %709 = vmatmul.mubr.msk.bf16.vlgmr.msra.gmra.mxu0 %vm375_vm7, %v677_v15 }
 0x181   : > { %v413_v25 = vpop.f32.mrf.mxu0 }
 0x182   : > { %v414_v26 = vadd.f32 %v676_v24, %v413_v25 }
 0x183   : > { %v710_v27 = vpop.f32.mrf.mxu0 }
 0x184   : > { %v422_v28 = vmul.f32 0.044715, %v414_v26  ;;  %v420_v44 = vmul.f32 0.5, %v414_v26 }
 0x185   : > { %v416_v29 = vpop.f32.mrf.mxu0 }
 0x186   : > { %v424_v30 = vmul.f32 %v422_v28, %v414_v26  ;;  %v417_v31 = vadd.f32 %v676_v24, %v416_v29 }
 0x187   : > { %v711_v32 = vpop.f32.mrf.mxu0 }
 0x188   : > { %v426_v33 = vmul.f32 %v424_v30, %v414_v26  ;;  %v423_v34 = vmul.f32 0.044715, %v417_v31  ;;  %v421_v45 = vmul.f32 0.5, %v417_v31 }
 0x18a   : > { %v425_v35 = vmul.f32 %v423_v34, %v417_v31  ;;  %v428_v36 = vadd.f32 %v426_v33, %v414_v26 }
 0x18c   : > { %v427_v37 = vmul.f32 %v425_v35, %v417_v31  ;;  %v430_v38 = vmul.f32 0.7978846, %v428_v36 }
 0x18e   : > { %v429_v39 = vadd.f32 %v427_v37, %v417_v31  ;;  %809 = vtanh.f32 %v430_v38 }
 0x190   : > { %v431_v40 = vmul.f32 0.7978846, %v429_v39 }
 0x192   : > { %811 = vtanh.f32 %v431_v40 }
 0x19b   : > { %v810_v41 = vpop.eup %809 }
 0x19c   : > { %v434_v42 = vadd.f32 1.0, %v810_v41 }
 0x19e   : > { %v436_v47 = vmul.f32 %v434_v42, %v420_v44 }
 0x19f   : > { %v812_v43 = vpop.eup %811 }
 0x1a0   : > { %v435_v46 = vadd.f32 1.0, %v812_v43 }
 0x1a2   : > { %v437_v48 = vmul.f32 %v435_v46, %v421_v45 }
 0x1a4   : > { %v438_v49 = vpack.c.bf16 %v437_v48, %v436_v47 }
 0x1a6   : > { %729 = vmatmul.mubr.bf16.vlgmr.msra.gmra.mxu1 %v438_v49 }
 0x266   : > { %v544_v51 = vpop.f32.mrf.mxu1 }
 0x267   : > { %v545_v52 = vadd.f32 %v680_v50, %v544_v51 }
 0x268   : > { %v730_v53 = vpop.f32.mrf.mxu1 }
 0x269   : > { %551 = vst [vmem:[%s318_s16] sm:$0xff] %v545_v52 }
 0x26a   : > { %v547_v54 = vpop.f32.mrf.mxu1 }
 0x26b   : > { %v548_v55 = vadd.f32 %v680_v50, %v547_v54 }
 0x26c   : > { %v731_v56 = vpop.f32.mrf.mxu1 }
 0x26d   : > { %552 = vst [vmem:[%s318_s16 + $0x8] sm:$0xff] %v548_v55 }
 0x26e   : > { %878 = shalt.err (!%p875_p3)
}
 0x26f   : > { %s879_s9 = scalar_lea.hbm %s1118_s21, 256  ;;  %s883_s15 = scalar_lea.hbm %s1167_s7, 512 }
 0x270   : > { %p880_p2 = scmp.ne.s32.totalorder %s1118_s21, %s879_s9  ;;  %p884_p7 = scmp.lt.s32.totalorder %s1118_s21, %s1167_s7 }
 0x271   : > { %p885_p6 = scmp.lt.s32.totalorder %s883_s15, %s879_s9 }
 0x272   : > { %p881_p4 = pnand %p880_p2, %p1023_p5 }
 0x273   : > { %p886_p9 = por %p885_p6, %p884_p7 }
 0x274   : > { %p882_p13 = pneg %p881_p4 }
 0x276   : > { %p887_p10 = pnand %p886_p9, %p882_p13 }
 0x278   : > { %890 = shalt.err (!%p887_p10)
}
 0x279   : > { %s943_s19 = smov 128   ;;  %s944_s20 = smov 8  }
 0x27a   : > { %740 = dma.vmem_to_hbm [thread:$0]  (%p1023_p5), %s1113_s17, 256, %s1118_s21, %s1120_s22, %s943_s19, %s943_s19, %s944_s20  }
 0x27b PF: > { %p757_p12 = scmp.ge.s32.totalorder %s933_s27, 2  ;;  %s582_s23 = sand.u32 1, %s921_s24  }
 0x27c   : > { %p1177_p8 = scmp.ne.s32.totalorder %s1170_s12, 0  ;;  %s583_s28 = scalar_lea.sflag [#allocation4], %s582_s23 }
 0x27e   : > { %p750_p11 = pnand %p757_p12, %p1177_p8 }
 0x280   : > { %p751_p0 = pneg %p750_p11 }
 0x282   : > { %916 = dma.done.wait (%p751_p0), %s583_s28, 256  }
 0x283   : > { %918 = vsyncadd (%p751_p0), %s583_s28, 4294967040  ;;  %p19_p1 = scmp.ge.s32.totalorder %s1010_s30, 4   ;;  %s1178_s24 = smov %s925_s25 }
 0x284   : > { %s1179_s25 = smov %s929_s26  ;;  %s1180_s26 = smov %s1021_s10 }
 0x285   : > { %s1181_s27 = smov %s1010_s30  ;;  %21 = sbr.rel (!%p19_p1) target bundleno = 5 (0x5), region = 95 }
 0x28a   :  { %588 = vsyncpa [#allocation3], 1 }
 0x28b   :  { %590 = vsyncpa [#allocation3 + $0x1], 1 }
 0x28c   :  { %591 = vsyncpa [#allocation6], 1 }
 0x28d   :  { %592 = vsyncpa [#allocation4], 1 }
 0x28e   :  { %594 = vsyncpa [#allocation4 + $0x1], 1 }

</bundles_post_ra>
